<compile_context>
chip_gen: v6e
topology: v6e:2x2x1
jax: 0.10.0
libtpu: 0.0.40
codegen_flags: <defaults>
</compile_context>

<pallas_src>
import functools

import jax
import jax.numpy as jnp
from jax.experimental import pallas as pl
from jax.experimental.pallas import tpu as pltpu


def _round_up(n, m):
    return ((n + m - 1) // m) * m


def mlp_kernel(x_ref, w1_ref, b1_ref, w2_ref, b2_ref, o_ref):
    # fc1: (tm, 32) bf16 @ (32, 128) bf16 -> f32 accum on the MXU.
    h = jnp.dot(x_ref[...], w1_ref[...], preferred_element_type=jnp.float32)
    # bias + ReLU in f32, re-quantize to bf16 for the second matmul.
    h = jnp.maximum(h + b1_ref[...], 0.0).astype(jnp.bfloat16)
    # fc2: (tm, 128) bf16 @ (128, A) bf16 -> f32 accum; narrow (A=8) store.
    out = jnp.dot(h, w2_ref[...], preferred_element_type=jnp.float32)
    o_ref[...] = (out + b2_ref[...]).astype(o_ref.dtype)


def prepare_params(w1, b1, w2, b2):
    """One-time weight preparation (cast only — no padding needed anymore).

    w1: (D_in, H) bf16,  b1: (1, H) f32,  w2: (H, A) bf16,  b2: (1, A) f32.
    Weights are stored pre-transposed as (in_features, out_features).
    """
    w1p = w1.astype(jnp.bfloat16)
    b1p = b1.astype(jnp.float32).reshape(1, -1)
    w2p = w2.astype(jnp.bfloat16)
    b2p = b2.astype(jnp.float32).reshape(1, -1)
    return w1p, b1p, w2p, b2p


def _choose_tm(b, block_b):
    """Static batch-tile selection (runs at trace time on Python ints)."""
    if b <= 32:
        # Tiny serving batch: single grid step; 16 rows = one packed bf16 vreg
        # worth of sublanes.  Launch + weight DMA dominate at this size anyway.
        return _round_up(b, 16)
    if b >= 2 * block_b:
        return block_b
    # Moderate batch: aim for >=2 grid steps so the parallel batch axis can
    # feed both v7x TensorCores, while keeping tiles sublane/lane friendly.
    return max(16, min(block_b, _round_up(pl.cdiv(b, 2), 256)))


@functools.partial(jax.jit, static_argnames=("block_b",))
def mlp_forward(x, w1p, b1p, w2p, b2p, *, block_b=512):
    """x: (B, D_in) any float dtype. Returns (B, A) float32."""
    # Matches PyTorch `x.float()`; then bf16 for the MXU operand path.
    x = x.astype(jnp.float32).astype(jnp.bfloat16)
    b, d_in = x.shape
    hidden = w1p.shape[1]
    act = w2p.shape[1]

    tm = _choose_tm(b, block_b)
    grid = (pl.cdiv(b, tm),)

    out = pl.pallas_call(
        mlp_kernel,
        out_shape=jax.ShapeDtypeStruct((b, act), jnp.float32),
        grid=grid,
        in_specs=[
            pl.BlockSpec((tm, d_in), lambda i: (i, 0)),      # x tile (ragged ok)
            pl.BlockSpec((d_in, hidden), lambda i: (0, 0)),  # w1 (resident)
            pl.BlockSpec((1, hidden), lambda i: (0, 0)),     # b1 (resident)
            pl.BlockSpec((hidden, act), lambda i: (0, 0)),   # w2 (resident)
            pl.BlockSpec((1, act), lambda i: (0, 0)),        # b2 (resident)
        ],
        out_specs=pl.BlockSpec((tm, act), lambda i: (i, 0)),
        compiler_params=pltpu.CompilerParams(
            dimension_semantics=("parallel",)
        ),
    )(x, w1p, b1p, w2p, b2p)

    return out


if __name__ == "__main__":
    # env_params: observation dim = 32, action dim = 8
    OBS = 32
    HIDDEN = 128
    ACTION = 8
    BATCH = 8

    key = jax.random.PRNGKey(0)
    k_x, k_w1, k_b1, k_w2, k_b2 = jax.random.split(key, 5)

    # Deterministic parameter init (uniform, PyTorch-like fan_in scaling).
    # Weights stored pre-transposed as (in_features, out_features).
    bound1 = 1.0 / (OBS ** 0.5)
    bound2 = 1.0 / (HIDDEN ** 0.5)
    w1 = jax.random.uniform(k_w1, (OBS, HIDDEN), jnp.float32, -bound1, bound1)
    b1 = jax.random.uniform(k_b1, (HIDDEN,), jnp.float32, -bound1, bound1)
    w2 = jax.random.uniform(k_w2, (HIDDEN, ACTION), jnp.float32, -bound2, bound2)
    b2 = jax.random.uniform(k_b2, (ACTION,), jnp.float32, -bound2, bound2)

    x = jax.random.normal(k_x, (BATCH, OBS), jnp.float32)

    # One-time parameter prep (bf16 cast), then the kernel call.
    w1p, b1p, w2p, b2p = prepare_params(w1, b1, w2, b2)
    out = mlp_forward(x, w1p, b1p, w2p, b2p)
    out = jax.block_until_ready(out)

    # Reference in plain JAX (f32). bf16 MXU operands with f32 accumulation
    # only match f32 to ~1e-2 relative, so the tolerance is relaxed.
    # (Documented deviation from the f32 PyTorch model.)
    ref = jnp.maximum(x @ w1 + b1, 0.0) @ w2 + b2
    assert out.shape == (BATCH, ACTION)
    err = float(jnp.max(jnp.abs(out - ref)))
    assert jnp.allclose(out, ref, atol=5e-2, rtol=5e-2), f"max abs err {err}"

    print("KERNEL_OK")
</pallas_src>

<mosaic_0001>
module attributes {stable_mosaic.version = 11 : i64} {
  func.func @mlp_kernel(%arg0: i32, %arg1: memref<16x32xbf16, #tpu.memory_space<vmem>>, %arg2: memref<32x128xbf16, #tpu.memory_space<vmem>>, %arg3: memref<1x128xf32, #tpu.memory_space<vmem>>, %arg4: memref<128x8xbf16, #tpu.memory_space<vmem>>, %arg5: memref<1x8xf32, #tpu.memory_space<vmem>>, %arg6: memref<16x8xf32, #tpu.memory_space<vmem>>) attributes {dimension_semantics = [#tpu.dimension_semantics<parallel>], iteration_bounds = array<i64: 1>, scalar_prefetch = 0 : i64, scratch_operands = 0 : i64, tpu.core_type = #tpu.core_type<tc>, window_params = [{transform_indices = @transform_0, window_bounds = array<i64: 16, 32>}, {pipeline_mode = #tpu.pipeline_mode<synchronous>, transform_indices = @transform_1, window_bounds = array<i64: 32, 128>}, {pipeline_mode = #tpu.pipeline_mode<synchronous>, transform_indices = @transform_2, window_bounds = array<i64: 1, 128>}, {pipeline_mode = #tpu.pipeline_mode<synchronous>, transform_indices = @transform_3, window_bounds = array<i64: 128, 8>}, {pipeline_mode = #tpu.pipeline_mode<synchronous>, transform_indices = @transform_4, window_bounds = array<i64: 1, 8>}, {transform_indices = @transform_5, window_bounds = array<i64: 16, 8>}]} {
    %c0 = arith.constant 0 : index
    %c0_0 = arith.constant 0 : index
    %0 = vector.load %arg1[%c0, %c0_0] : memref<16x32xbf16, #tpu.memory_space<vmem>>, vector<16x32xbf16>
    %c0_1 = arith.constant 0 : index
    %c0_2 = arith.constant 0 : index
    %1 = vector.load %arg2[%c0_1, %c0_2] : memref<32x128xbf16, #tpu.memory_space<vmem>>, vector<32x128xbf16>
    %cst = arith.constant dense<0.000000e+00> : vector<16x128xf32>
    %2 = tpu.matmul %0, %1, %cst {dimension_numbers = #tpu.dot_dimension_numbers<[1], [0], [0], [1], [0, 0, 1, 1], [], []>} : vector<16x32xbf16>, vector<32x128xbf16>, vector<16x128xf32> -> vector<16x128xf32>
    %c0_3 = arith.constant 0 : index
    %c0_4 = arith.constant 0 : index
    %3 = vector.load %arg3[%c0_3, %c0_4] : memref<1x128xf32, #tpu.memory_space<vmem>>, vector<1x128xf32>
    %4 = vector.broadcast %3 : vector<1x128xf32> to vector<16x128xf32>
    %5 = arith.addf %2, %4 : vector<16x128xf32>
    %cst_5 = arith.constant 0.000000e+00 : f32
    %6 = vector.broadcast %cst_5 : f32 to vector<16x128xf32>
    %7 = arith.maximumf %5, %6 : vector<16x128xf32>
    %8 = arith.truncf %7 : vector<16x128xf32> to vector<16x128xbf16>
    %c0_6 = arith.constant 0 : index
    %c0_7 = arith.constant 0 : index
    %9 = vector.load %arg4[%c0_6, %c0_7] : memref<128x8xbf16, #tpu.memory_space<vmem>>, vector<128x8xbf16>
    %cst_8 = arith.constant dense<0.000000e+00> : vector<16x8xf32>
    %10 = tpu.matmul %8, %9, %cst_8 {dimension_numbers = #tpu.dot_dimension_numbers<[1], [0], [0], [1], [0, 0, 1, 1], [], []>} : vector<16x128xbf16>, vector<128x8xbf16>, vector<16x8xf32> -> vector<16x8xf32>
    %c0_9 = arith.constant 0 : index
    %c0_10 = arith.constant 0 : index
    %11 = vector.load %arg5[%c0_9, %c0_10] : memref<1x8xf32, #tpu.memory_space<vmem>>, vector<1x8xf32>
    %12 = vector.broadcast %11 : vector<1x8xf32> to vector<16x8xf32>
    %13 = arith.addf %10, %12 : vector<16x8xf32>
    %c0_11 = arith.constant 0 : index
    %c0_12 = arith.constant 0 : index
    %14 = vector.load %arg6[%c0_11, %c0_12] : memref<16x8xf32, #tpu.memory_space<vmem>>, vector<16x8xf32>
    tpu.vector_store %arg6[%c0_11, %c0_12], %13 {strides = array<i32>} : memref<16x8xf32, #tpu.memory_space<vmem>>, vector<16x8xf32>,
    return
  }
  func.func @transform_0(%arg0: i32) -> (i32, i32) {
    %c0_i32 = arith.constant 0 : i32
    %c0_i32_0 = arith.constant 0 : i32
    return %arg0, %c0_i32 : i32, i32
  }
  func.func @transform_1(%arg0: i32) -> (i32, i32) {
    %c0_i32 = arith.constant 0 : i32
    %c0_i32_0 = arith.constant 0 : i32
    %c0_i32_1 = arith.constant 0 : i32
    return %c0_i32, %c0_i32_0 : i32, i32
  }
  func.func @transform_2(%arg0: i32) -> (i32, i32) {
    %c0_i32 = arith.constant 0 : i32
    %c0_i32_0 = arith.constant 0 : i32
    %c0_i32_1 = arith.constant 0 : i32
    return %c0_i32, %c0_i32_0 : i32, i32
  }
  func.func @transform_3(%arg0: i32) -> (i32, i32) {
    %c0_i32 = arith.constant 0 : i32
    %c0_i32_0 = arith.constant 0 : i32
    %c0_i32_1 = arith.constant 0 : i32
    return %c0_i32, %c0_i32_0 : i32, i32
  }
  func.func @transform_4(%arg0: i32) -> (i32, i32) {
    %c0_i32 = arith.constant 0 : i32
    %c0_i32_0 = arith.constant 0 : i32
    %c0_i32_1 = arith.constant 0 : i32
    return %c0_i32, %c0_i32_0 : i32, i32
  }
  func.func @transform_5(%arg0: i32) -> (i32, i32) {
    %c0_i32 = arith.constant 0 : i32
    %c0_i32_0 = arith.constant 0 : i32
    return %arg0, %c0_i32 : i32, i32
  }
}

</mosaic_0001>

<bundles_post_ra>
// kernel: mlp_forward.1
= control target key start
LH: loop header
LB: loop body
LE: loop exit
PB: predicated region body
PF: predicated region fallthrough
CT: control target
= control target key end

     0   :  { %10 = vsyncpa [#allocation3], 0  ;;  %v323_v1 = vmov 0.0   ;;  %vm324_vm0 = vmmov 0   ;;  %vm52_vm1 = vcmask 261120   ;;  %vm212_vm2 = vcmask 64512   ;;  %s400_s0 = inlined_call_operand.vmem [shape: bf16[8,32], index: 0, kind: input, shape index: {}]   ;;  %s401_s1 = inlined_call_operand.vmem [shape: bf16[32,128], index: 1, kind: input, shape index: {}]   ;;  %s402_s2 = inlined_call_operand.vmem [shape: f32[1,128], index: 2, kind: input, shape index: {}]   ;;  %s403_s3 = inlined_call_operand.vmem [shape: bf16[128,8], index: 3, kind: input, shape index: {}]   ;;  %s404_s4 = inlined_call_operand.vmem [shape: f32[1,8], index: 4, kind: input, shape index: {}]   ;;  %s405_s5 = inlined_call_operand.hbm [shape: f32[8,8], index: 5, kind: output, shape index: {}]  }
   0x1   :  { %v290_v0 = vld [vmem:[%s401_s1 + $0x8] sm:$0xff]   ;;  %257 = vmatprep.subr.bf16.mxu0 %v323_v1  ;;  %265 = vmatprep.subr.bf16.mxu1 %v323_v1  ;;  %v291_v2 = vld [vmem:[%s401_s1] sm:$0xff]   ;;  %v293_v3 = vld [vmem:[%s403_s3 + $0x38] sm:$0xff]  }
   0x2   :  { %258 = vmatpush3.bf16.msra.mxu0 %v290_v0  ;;  %261 = vmatprep.mubr.msk.bf16.mxu0 %vm324_vm0, %v323_v1  ;;  %v292_v4 = vld [vmem:[%s400_s0] sm:$0xff]   ;;  %v294_v5 = vld [vmem:[%s403_s3 + $0x30] sm:$0xff]   ;;  %v295_v6 = vld [vmem:[%s403_s3 + $0x28] sm:$0xff]  }
   0x3   :  { %259 = vmatprep.subr.bf16.mxu0 %v323_v1  ;;  %281 = vmatprep.mubr.msk.bf16.mxu1 %vm324_vm0, %v323_v1  ;;  %v296_v7 = vld [vmem:[%s403_s3 + $0x20] sm:$0xff]   ;;  %v297_v8 = vld [vmem:[%s403_s3 + $0x18] sm:$0xff]   ;;  %v298_v9 = vld [vmem:[%s403_s3 + $0x10] sm:$0xff]  }
   0x4   :  { %266 = vmatpush3.bf16.msra.mxu1 %v293_v3  ;;  %v299_v10 = vld [vmem:[%s403_s3 + $0x8] sm:$0xff]   ;;  %v300_v11 = vld [vmem:[%s403_s3] sm:$0xff]  }
   0x5   :  { %267 = vmatprep.subr.bf16.mxu1 %v323_v1  ;;  %v231_v12 = vld [vmem:[%s402_s2] ss:$0 sm:$0xff] }
   0x6   :  { %260 = vmatpush3.bf16.msra.mxu0 %v291_v2  ;;  %v236_v22 = vld [vmem:[%s404_s4] ss:$0 sm:$0xff] }
   0x8   :  { %268 = vmatpush3.bf16.msra.mxu1 %v294_v5 }
   0x9   :  { %262 = vmatmul.mubr.msk.bf16.vlgmr.msra.gmra.mxu0 %vm52_vm1, %v292_v4  ;;  %269 = vmatprep.subr.bf16.mxu1 %v323_v1 }
   0xc   :  { %270 = vmatpush3.bf16.msra.mxu1 %v295_v6 }
   0xd   :  { %271 = vmatprep.subr.bf16.mxu1 %v323_v1 }
  0x10   :  { %272 = vmatpush3.bf16.msra.mxu1 %v296_v7 }
  0x11   :  { %273 = vmatprep.subr.bf16.mxu1 %v323_v1 }
  0x14   :  { %274 = vmatpush3.bf16.msra.mxu1 %v297_v8 }
  0x15   :  { %275 = vmatprep.subr.bf16.mxu1 %v323_v1 }
  0x18   :  { %276 = vmatpush3.bf16.msra.mxu1 %v298_v9 }
  0x19   :  { %277 = vmatprep.subr.bf16.mxu1 %v323_v1 }
  0x1c   :  { %278 = vmatpush3.bf16.msra.mxu1 %v299_v10 }
  0x1d   :  { %279 = vmatprep.subr.bf16.mxu1 %v323_v1 }
  0x20   :  { %280 = vmatpush3.bf16.msra.mxu1 %v300_v11 }
  0xc9   :  { %v90_v13 = vpop.f32.mrf.mxu0 }
  0xca   :  { %v91_v15 = vadd.f32 %v231_v12, %v90_v13 }
  0xcb   :  { %v263_v14 = vpop.f32.mrf.mxu0 }
  0xcc   :  { %v97_v19 = vmax.f32 %v91_v15, 0.0 }
  0xcd   :  { %v93_v16 = vpop.f32.mrf.mxu0 }
  0xce   :  { %v94_v17 = vadd.f32 %v231_v12, %v93_v16 }
  0xcf   :  { %v264_v18 = vpop.f32.mrf.mxu0 }
  0xd0   :  { %v98_v20 = vmax.f32 %v94_v17, 0.0 }
  0xd2   :  { %v99_v21 = vpack.c.bf16 %v98_v20, %v97_v19 }
  0xd4   :  { %282 = vmatmul.mubr.bf16.vlgmr.msra.gmra.mxu1 %v99_v21 }
 0x194   :  { %v205_v23 = vpop.f32.mrf.mxu1 }
 0x195   :  { %v206_v24 = vadd.f32 %v236_v22, %v205_v23 }
 0x196   :  { %v283_v25 = vpop.f32.mrf.mxu1 }
 0x197   :  { %213 = vst.msk [vmem:[#allocation2] sm:$0xff] %vm212_vm2, %v206_v24 }
 0x198   :  { %v208_v26 = vpop.f32.mrf.mxu1 }
 0x199   :  { %v209_v27 = vadd.f32 %v236_v22, %v208_v26 }
 0x19a   :  { %v284_v28 = vpop.f32.mrf.mxu1 }
 0x19b   :  { %214 = vst.msk [vmem:[#allocation2 + $0x8] sm:$0xff] %vm212_vm2, %v209_v27 }
 0x19c   :  { %219 = vsyncadd [#allocation3], 128  ;;  %s325_s2 = smov [#allocation2]  }
 0x19d   :  { %s220_s3 = sshll.u32 %s325_s2, 4  ;;  %s221_s3 = int_to_ptr.vmem [resolvable:$true] %s220_s3 }
 0x19e   :  { %s301_s17 = scalar_lea.vmem %s221_s3, 128  ;;  %s305_s18 = scalar_lea.vmem %s221_s3, 256 }
 0x19f   :  { %p302_p0 = scmp.ne.s32.totalorder %s221_s3, %s301_s17  ;;  %p306_p1 = scmp.lt.s32.totalorder %s221_s3, %s221_s3 }
 0x1a0   :  { %p307_p2 = scmp.lt.s32.totalorder %s305_s18, %s301_s17 }
 0x1a2   :  { %p308_p3 = por %p307_p2, %p306_p1 }
 0x1a4   :  { %p309_p4 = pnand %p308_p3, %p302_p0 }
 0x1a6   :  { %312 = shalt.err (!%p309_p4)
}
 0x1a7   :  { %s326_s4 = smov 128   ;;  %s327_s19 = smov 8  }
 0x1a8   :  { %226 = dma.vmem_to_hbm [thread:$0]  %s221_s3, 128, %s405_s5, [#allocation3], %s326_s4, %s326_s4, %s327_s19  }
 0x1a9   :  { %321 = dma.done.wait [#allocation3], 256  }
 0x1aa   :  { %322 = vsyncadd [#allocation3], 4294967040 }
 0x1ab   :  { %230 = vsyncpa [#allocation3], 1 }

</bundles_post_ra>
